<compile_context>
chip_gen: v7x
topology: tpu7x:2x2x1
jax: 0.10.0
libtpu: 0.0.40
codegen_flags: <defaults>
</compile_context>

<pallas_src>
import math
import functools

import jax
import jax.numpy as jnp
from jax.experimental import pallas as pl
from jax.experimental.pallas import tpu as pltpu

_MIB = 1024 * 1024


# ---------------------------------------------------------------------------
# Capability / hardware probes (all guarded: degrade gracefully if unsupported).
# ---------------------------------------------------------------------------

@functools.lru_cache(maxsize=None)
def _single_buffer_mode():
    """Return pl.Buffered(1) if single-buffering constant blocks is supported."""
    try:
        mode = pl.Buffered(buffer_count=1)

        def _probe(x_ref, o_ref):
            o_ref[...] = x_ref[...]

        probe = pl.pallas_call(
            _probe,
            out_shape=jax.ShapeDtypeStruct((8, 128), jnp.float32),
            grid=(1,),
            in_specs=[pl.BlockSpec((8, 128), lambda i: (0, 0), pipeline_mode=mode)],
            out_specs=pl.BlockSpec((8, 128), lambda i: (0, 0)),
        )
        jax.jit(probe).lower(jax.ShapeDtypeStruct((8, 128), jnp.float32))
        return mode
    except Exception:
        return None


@functools.lru_cache(maxsize=None)
def _vmem_limit_bytes():
    """Per-generation VMEM limit: physical capacity minus headroom for the compiler."""
    try:
        cap = int(pltpu.get_tpu_info().vmem_capacity_bytes)
    except Exception:
        cap = 64 * _MIB  # conservative (v7x-sized) fallback
    return max(32 * _MIB, cap - 12 * _MIB)


def _const_spec(block_shape):
    """BlockSpec for a grid-constant block (weights/biases).

    The index map never changes, so the block is DMA'd once; single-buffer it when
    pipeline_mode is available so it does not pay a 2x VMEM cost."""
    zeros = (0,) * len(block_shape)
    idx = lambda *_: zeros
    mode = _single_buffer_mode()
    if mode is not None:
        return pl.BlockSpec(block_shape, idx, pipeline_mode=mode)
    return pl.BlockSpec(block_shape, idx)


# ---------------------------------------------------------------------------
# VMEM-budget-aware tile selection.
# ---------------------------------------------------------------------------

def _pad8(x):
    return -(-x // 8) * 8


def _pad128(x):
    return -(-x // 128) * 128


def _tile_candidates(S, cap=1024):
    cands = {t for t in (1024, 512, 256, 128, 64, 32, 16, 8)
             if t <= min(S, cap) and S % t == 0}
    if S <= cap:
        cands.add(S)
    if not cands:
        cands.add(S)  # ragged fallback: a single full-S tile is always legal
    return sorted(cands, reverse=True)


def _attn_vmem_estimate(tq, tk, H, heads, d, csize, osize, has_mask, mask_size):
    Hp = _pad128(H)
    in_bufs = 2 * (_pad8(tq) * Hp * csize + 2 * _pad8(tk) * Hp * csize)      # q + k + v
    if has_mask:
        in_bufs += 2 * _pad8(tq) * _pad128(tk) * mask_size
    out_bufs = 2 * _pad8(tq) * Hp * osize
    weights = _pad8(H) * Hp * csize + Hp * 4                                 # wo + bo
    if _single_buffer_mode() is None:
        weights *= 2
    scratch = heads * _pad8(tq) * _pad128(d) * 4 + 2 * heads * _pad8(tq) * 128 * 4
    interm = 4 * heads * _pad8(tq) * _pad128(tk) * 4                         # scores/probs
    return in_bufs + out_bufs + weights + scratch + interm


def _pick_attn_tiles(S, H, heads, d, csize, osize, has_mask, mask_size, budget):
    q_cands = _tile_candidates(S)
    # With an explicit mask tensor, its block's last dim must be lane-legal
    # (multiple of 128 or the full sequence length).
    k_cands = [t for t in _tile_candidates(S)
               if (not has_mask) or t == S or t % 128 == 0]
    if not k_cands:
        k_cands = [S]
    best = None
    for tq in q_cands:
        for tk in k_cands:
            if _attn_vmem_estimate(tq, tk, H, heads, d, csize, osize,
                                   has_mask, mask_size) > budget:
                continue
            key = (tq * tk, tq)
            if best is None or key > best[1]:
                best = ((tq, tk), key)
    if best is None:
        raise ValueError(
            "MultiHeadedAttention: no (q_tile, kv_tile) fits the VMEM budget "
            f"({budget} bytes) for S={S}, H={H}, heads={heads}; reduce hidden size "
            "or raise the VMEM limit.")
    return best[0]


def _proj_vmem_estimate(ts, H, csize, n_inputs, in_size):
    Hp = _pad128(H)
    in_bufs = 2 * n_inputs * _pad8(ts) * Hp * in_size
    out_bufs = 2 * 3 * _pad8(ts) * Hp * csize
    weights = 3 * (_pad8(H) * Hp * csize + Hp * 4)
    if _single_buffer_mode() is None:
        weights *= 2
    interm = 3 * _pad8(ts) * Hp * 4
    return in_bufs + out_bufs + weights + interm


def _pick_proj_tile(S, H, csize, n_inputs, in_size, budget):
    cands = _tile_candidates(S)
    for ts in cands:
        if _proj_vmem_estimate(ts, H, csize, n_inputs, in_size) <= budget:
            return ts
    # Weights dominate here regardless of tiling; fall back to the smallest tile.
    return min(cands)


# ---------------------------------------------------------------------------
# Kernels.
# ---------------------------------------------------------------------------

def _qkv_proj_kernel(*refs, scale, compute_dtype, self_attn):
    """Fused Q/K/V input projections for one (batch, seq-tile) block."""
    if self_attn:
        (x_ref, wq_ref, bq_ref, wk_ref, bk_ref, wv_ref, bv_ref,
         q_out, k_out, v_out) = refs
        xq = xk = xv = x_ref[0].astype(compute_dtype)
    else:
        (xq_ref, xk_ref, xv_ref, wq_ref, bq_ref, wk_ref, bk_ref, wv_ref, bv_ref,
         q_out, k_out, v_out) = refs
        xq = xq_ref[0].astype(compute_dtype)
        xk = xk_ref[0].astype(compute_dtype)
        xv = xv_ref[0].astype(compute_dtype)

    q = jnp.dot(xq, wq_ref[...], preferred_element_type=jnp.float32) + bq_ref[...]
    q_out[0] = (q * scale).astype(q_out.dtype)          # fold 1/sqrt(d) into Q once
    k = jnp.dot(xk, wk_ref[...], preferred_element_type=jnp.float32) + bk_ref[...]
    k_out[0] = k.astype(k_out.dtype)
    v = jnp.dot(xv, wv_ref[...], preferred_element_type=jnp.float32) + bv_ref[...]
    v_out[0] = v.astype(v_out.dtype)


def _attn_kernel(*refs, heads_num, per_head_size, compute_dtype, has_mask, mask_value):
    """Flash-style attention (online softmax over kv tiles) + final linear."""
    if has_mask:
        (q_ref, k_ref, v_ref, mask_ref, wo_ref, bo_ref,
         o_ref, m_scr, l_scr, acc_scr) = refs
    else:
        (q_ref, k_ref, v_ref, wo_ref, bo_ref,
         o_ref, m_scr, l_scr, acc_scr) = refs

    h, d = heads_num, per_head_size
    tq = q_ref.shape[1]
    tk = k_ref.shape[1]
    kv = pl.program_id(2)

    @pl.when(kv == 0)
    def _():
        m_scr[...] = jnp.full(m_scr.shape, -jnp.inf, dtype=m_scr.dtype)
        l_scr[...] = jnp.zeros(l_scr.shape, dtype=l_scr.dtype)
        acc_scr[...] = jnp.zeros(acc_scr.shape, dtype=acc_scr.dtype)

    # Head-split the lane-dense [t, H] blocks into [h, t, d] compute layout.
    qh = jnp.swapaxes(q_ref[0].reshape(tq, h, d), 0, 1)   # [h, tq, d] (scale pre-folded)
    kh = jnp.swapaxes(k_ref[0].reshape(tk, h, d), 0, 1)   # [h, tk, d]
    vh = jnp.swapaxes(v_ref[0].reshape(tk, h, d), 0, 1)   # [h, tk, d]

    # Head-batched QK^T with f32 accumulation (no explicit K transpose).
    s = jnp.einsum('hqd,hkd->hqk', qh, kh, preferred_element_type=jnp.float32)

    if has_mask:
        s = s + mask_ref[0, 0].astype(jnp.float32)[None, :, :]
    else:
        # In-kernel causal mask: nothing streamed from HBM.
        rows = jax.lax.broadcasted_iota(jnp.int32, (tq, tk), 0) + pl.program_id(1) * tq
        cols = jax.lax.broadcasted_iota(jnp.int32, (tq, tk), 1) + kv * tk
        bias = jnp.where(cols <= rows, 0.0, mask_value).astype(jnp.float32)
        s = s + bias[None, :, :]

    # Online softmax across kv tiles; all running statistics stay f32.
    m_prev = m_scr[...]
    m_new = jnp.maximum(m_prev, jnp.max(s, axis=-1, keepdims=True))
    alpha = jnp.exp(m_prev - m_new)
    p = jnp.exp(s - m_new)
    l_scr[...] = alpha * l_scr[...] + jnp.sum(p, axis=-1, keepdims=True)
    acc_scr[...] = alpha * acc_scr[...] + jnp.einsum(
        'hqk,hkd->hqd', p.astype(compute_dtype), vh,
        preferred_element_type=jnp.float32)
    m_scr[...] = m_new

    # Finalize once per q tile: normalize, merge heads, final linear.
    @pl.when(kv == pl.num_programs(2) - 1)
    def _():
        ctx = acc_scr[...] * pl.reciprocal(l_scr[...], approx=True)        # [h, tq, d]
        ctx = jnp.swapaxes(ctx, 0, 1).reshape(tq, h * d).astype(compute_dtype)
        out = jnp.dot(ctx, wo_ref[...], preferred_element_type=jnp.float32) + bo_ref[...]
        o_ref[0] = out.astype(o_ref.dtype)


# ---------------------------------------------------------------------------
# Wrapper.
# ---------------------------------------------------------------------------

def multi_headed_attention(key, value, query, mask, params, heads_num, *,
                           causal=False, q_tile=None, kv_tile=None,
                           use_bf16_matmul=True, mask_value=-1e9):
    """Pallas forward of MultiHeadedAttention (eval mode).

    params: dict with wq, bq, wk, bk, wv, bv, wo, bo in PyTorch nn.Linear layout
    (weights [out, in], biases [out]).  `mask` is additive [B, 1, S, S]; pass it in
    bf16 to halve its HBM traffic (it is upcast to f32 in-kernel), or pass
    causal=True (mask ignored / may be None) to generate a causal mask in-kernel.
    """
    B, S, H = query.shape
    assert key.shape == value.shape == query.shape
    assert H % heads_num == 0, "hidden_size must be divisible by heads_num"
    d = H // heads_num
    scale = 1.0 / math.sqrt(float(d))

    compute_dtype = jnp.bfloat16 if use_bf16_matmul else jnp.float32
    csize = jnp.dtype(compute_dtype).itemsize
    osize = jnp.dtype(query.dtype).itemsize
    in_size = jnp.dtype(query.dtype).itemsize

    vmem_limit = _vmem_limit_bytes()
    budget = int(0.7 * vmem_limit)
    cparams2 = pltpu.CompilerParams(
        dimension_semantics=("parallel", "parallel"),
        vmem_limit_bytes=vmem_limit)
    cparams3 = pltpu.CompilerParams(
        # batch and query-tile axes shard across TensorCores (megacore); the kv axis
        # is the online-softmax reduction and must stay sequential.
        dimension_semantics=("parallel", "parallel", "arbitrary"),
        vmem_limit_bytes=vmem_limit)

    # Pre-transpose weights so kernels do x @ W directly; biases stay f32 [1, H].
    wq = jnp.asarray(params["wq"]).T.astype(compute_dtype)
    wk = jnp.asarray(params["wk"]).T.astype(compute_dtype)
    wv = jnp.asarray(params["wv"]).T.astype(compute_dtype)
    wo = jnp.asarray(params["wo"]).T.astype(compute_dtype)
    bq = jnp.asarray(params["bq"]).reshape(1, H).astype(jnp.float32)
    bk = jnp.asarray(params["bk"]).reshape(1, H).astype(jnp.float32)
    bv = jnp.asarray(params["bv"]).reshape(1, H).astype(jnp.float32)
    bo = jnp.asarray(params["bo"]).reshape(1, H).astype(jnp.float32)

    # ---------------- 1) fused Q/K/V projections (grid = B x seq tiles) ----------
    self_attn = (key is value) and (key is query)         # self-attention input dedupe
    n_inputs = 1 if self_attn else 3
    ts = _pick_proj_tile(S, H, csize, n_inputs, in_size, budget)

    x_spec = pl.BlockSpec((1, ts, H), lambda b, st: (b, st, 0))
    w_spec = _const_spec((H, H))
    b_spec = _const_spec((1, H))
    proj_out_spec = pl.BlockSpec((1, ts, H), lambda b, st: (b, st, 0))

    proj_kernel = functools.partial(_qkv_proj_kernel, scale=scale,
                                    compute_dtype=compute_dtype, self_attn=self_attn)
    if self_attn:
        proj_in_specs = [x_spec, w_spec, b_spec, w_spec, b_spec, w_spec, b_spec]
        proj_args = (query, wq, bq, wk, bk, wv, bv)
    else:
        proj_in_specs = [x_spec, x_spec, x_spec,
                         w_spec, b_spec, w_spec, b_spec, w_spec, b_spec]
        proj_args = (query, key, value, wq, bq, wk, bk, wv, bv)

    qp, kp, vp = pl.pallas_call(
        proj_kernel,
        out_shape=tuple(jax.ShapeDtypeStruct((B, S, H), compute_dtype) for _ in range(3)),
        grid_spec=pltpu.PrefetchScalarGridSpec(
            num_scalar_prefetch=0,
            grid=(B, S // ts),
            in_specs=proj_in_specs,
            out_specs=(proj_out_spec, proj_out_spec, proj_out_spec)),
        compiler_params=cparams2,
    )(*proj_args)

    # ---------------- 2) flash-style attention + final projection ----------------
    has_mask = not causal
    if has_mask and mask is None:
        raise ValueError("mask must be provided unless causal=True")
    mask_size = jnp.dtype(mask.dtype).itemsize if has_mask else 0

    if q_tile is None or kv_tile is None:
        auto_q, auto_k = _pick_attn_tiles(S, H, heads_num, d, csize, osize,
                                          has_mask, mask_size, budget)
        tq = q_tile if q_tile is not None else auto_q
        tk = kv_tile if kv_tile is not None else auto_k
    else:
        tq, tk = q_tile, kv_tile
    if S % tq or S % tk:
        raise ValueError("q_tile and kv_tile must divide seq_length")
    if has_mask and not (tk == S or tk % 128 == 0):
        raise ValueError("with an explicit mask, kv_tile must be a multiple of 128 "
                         "or the full sequence length (mask tile lane constraint)")

    attn_kernel = functools.partial(
        _attn_kernel, heads_num=heads_num, per_head_size=d,
        compute_dtype=compute_dtype, has_mask=has_mask, mask_value=float(mask_value))

    q_spec = pl.BlockSpec((1, tq, H), lambda b, qt, kv: (b, qt, 0))
    kv_spec = pl.BlockSpec((1, tk, H), lambda b, qt, kv: (b, kv, 0))
    out_spec = pl.BlockSpec((1, tq, H), lambda b, qt, kv: (b, qt, 0))

    in_specs = [q_spec, kv_spec, kv_spec]
    args = [qp, kp, vp]
    if has_mask:
        in_specs.append(pl.BlockSpec((1, 1, tq, tk), lambda b, qt, kv: (b, 0, qt, kv)))
        args.append(mask)
    in_specs += [_const_spec((H, H)), _const_spec((1, H))]
    args += [wo, bo]

    return pl.pallas_call(
        attn_kernel,
        out_shape=jax.ShapeDtypeStruct((B, S, H), query.dtype),
        grid_spec=pltpu.PrefetchScalarGridSpec(
            num_scalar_prefetch=0,
            grid=(B, S // tq, S // tk),
            in_specs=in_specs,
            out_specs=out_spec,
            scratch_shapes=[
                pltpu.VMEM((heads_num, tq, 1), jnp.float32),   # running max
                pltpu.VMEM((heads_num, tq, 1), jnp.float32),   # running denominator
                pltpu.VMEM((heads_num, tq, d), jnp.float32),   # output accumulator
            ]),
        compiler_params=cparams3,
    )(*args)


# ---------------------------------------------------------------------------
# Pure-JAX reference (mirrors the PyTorch forward, eval mode).
# ---------------------------------------------------------------------------

def _reference(key, value, query, mask, params, heads_num):
    B, S, H = query.shape
    d = H // heads_num

    def linear(x, w, b):
        return jnp.einsum("bsh,oh->bso", x, w) + b

    def split(x):
        return x.reshape(B, S, heads_num, d).transpose(0, 2, 1, 3)

    q = split(linear(query, params["wq"], params["bq"]))
    k = split(linear(key, params["wk"], params["bk"]))
    v = split(linear(value, params["wv"], params["bv"]))
    scores = jnp.einsum("bhqd,bhkd->bhqk", q, k) / math.sqrt(float(d))
    scores = scores + mask.astype(jnp.float32)
    probs = jax.nn.softmax(scores, axis=-1)
    ctx = jnp.einsum("bhqk,bhkd->bhqd", probs, v).transpose(0, 2, 1, 3).reshape(B, S, H)
    return jnp.einsum("bsh,oh->bso", ctx, params["wo"]) + params["bo"]


if __name__ == "__main__":
    B, S, H, HEADS = 2, 16, 32, 4

    root = jax.random.PRNGKey(0)
    keys = jax.random.split(root, 12)

    # PyTorch nn.Linear default init: U(-1/sqrt(in), 1/sqrt(in)).
    bound = 1.0 / math.sqrt(H)
    params = {
        "wq": jax.random.uniform(keys[0], (H, H), jnp.float32, -bound, bound),
        "bq": jax.random.uniform(keys[1], (H,), jnp.float32, -bound, bound),
        "wk": jax.random.uniform(keys[2], (H, H), jnp.float32, -bound, bound),
        "bk": jax.random.uniform(keys[3], (H,), jnp.float32, -bound, bound),
        "wv": jax.random.uniform(keys[4], (H, H), jnp.float32, -bound, bound),
        "bv": jax.random.uniform(keys[5], (H,), jnp.float32, -bound, bound),
        "wo": jax.random.uniform(keys[6], (H, H), jnp.float32, -bound, bound),
        "bo": jax.random.uniform(keys[7], (H,), jnp.float32, -bound, bound),
    }

    key_in = jax.random.normal(keys[8], (B, S, H), jnp.float32)
    value_in = jax.random.normal(keys[9], (B, S, H), jnp.float32)
    query_in = jax.random.normal(keys[10], (B, S, H), jnp.float32)

    # Additive causal mask in bf16 (recommended low-traffic format), [B, 1, S, S].
    causal_bias = jnp.where(jnp.tril(jnp.ones((S, S), jnp.float32)) > 0, 0.0, -1e9)
    mask = jnp.broadcast_to(causal_bias, (B, 1, S, S)).astype(jnp.bfloat16)

    # 1) General (cross-attention style) inputs, explicit additive mask, f32 MXU
    #    operands, explicit tiles; tight tolerance.
    ref = _reference(key_in, value_in, query_in, mask, params, HEADS)
    out = multi_headed_attention(key_in, value_in, query_in, mask, params, HEADS,
                                 q_tile=8, kv_tile=S, use_bf16_matmul=False)
    out = jax.block_until_ready(out)
    assert out.shape == (B, S, H)
    assert jnp.allclose(out, ref, atol=2e-3, rtol=2e-3), "f32 masked kernel mismatch"

    # 2) Same problem on the default bf16-operand path with auto (VMEM-aware) tiling.
    out_bf16 = multi_headed_attention(key_in, value_in, query_in, mask, params, HEADS)
    out_bf16 = jax.block_until_ready(out_bf16)
    assert jnp.allclose(out_bf16, ref, atol=5e-2, rtol=5e-2), "bf16 masked kernel mismatch"

    # 3) Self-attention (q = k = v streamed once) with the in-kernel causal mask and
    #    small tiles, exercising the online-softmax accumulation across 2 kv steps.
    x_in = query_in
    ref_self = _reference(x_in, x_in, x_in, mask, params, HEADS)
    out_self = multi_headed_attention(x_in, x_in, x_in, None, params, HEADS,
                                      causal=True, q_tile=8, kv_tile=8)
    out_self = jax.block_until_ready(out_self)
    assert jnp.allclose(out_self, ref_self, atol=5e-2, rtol=5e-2), "causal self-attn mismatch"

    print("KERNEL_OK")
</pallas_src>

<mosaic_0001>
module attributes {stable_mosaic.version = 11 : i64} {
  func.func @_qkv_proj_kernel(%arg0: i32, %arg1: i32, %arg2: memref<1x16x32xf32, #tpu.memory_space<vmem>>, %arg3: memref<1x16x32xf32, #tpu.memory_space<vmem>>, %arg4: memref<1x16x32xf32, #tpu.memory_space<vmem>>, %arg5: memref<32x32xf32, #tpu.memory_space<vmem>>, %arg6: memref<1x32xf32, #tpu.memory_space<vmem>>, %arg7: memref<32x32xf32, #tpu.memory_space<vmem>>, %arg8: memref<1x32xf32, #tpu.memory_space<vmem>>, %arg9: memref<32x32xf32, #tpu.memory_space<vmem>>, %arg10: memref<1x32xf32, #tpu.memory_space<vmem>>, %arg11: memref<1x16x32xf32, #tpu.memory_space<vmem>>, %arg12: memref<1x16x32xf32, #tpu.memory_space<vmem>>, %arg13: memref<1x16x32xf32, #tpu.memory_space<vmem>>) attributes {dimension_semantics = [#tpu.dimension_semantics<parallel>, #tpu.dimension_semantics<parallel>], iteration_bounds = array<i64: 2, 1>, scalar_prefetch = 0 : i64, scratch_operands = 0 : i64, tpu.core_type = #tpu.core_type<tc>, window_params = [{transform_indices = @transform_0, window_bounds = array<i64: 1, 16, 32>}, {transform_indices = @transform_1, window_bounds = array<i64: 1, 16, 32>}, {transform_indices = @transform_2, window_bounds = array<i64: 1, 16, 32>}, {pipeline_mode = #tpu.pipeline_mode<synchronous>, transform_indices = @transform_3, window_bounds = array<i64: 32, 32>}, {pipeline_mode = #tpu.pipeline_mode<synchronous>, transform_indices = @transform_4, window_bounds = array<i64: 1, 32>}, {pipeline_mode = #tpu.pipeline_mode<synchronous>, transform_indices = @transform_5, window_bounds = array<i64: 32, 32>}, {pipeline_mode = #tpu.pipeline_mode<synchronous>, transform_indices = @transform_6, window_bounds = array<i64: 1, 32>}, {pipeline_mode = #tpu.pipeline_mode<synchronous>, transform_indices = @transform_7, window_bounds = array<i64: 32, 32>}, {pipeline_mode = #tpu.pipeline_mode<synchronous>, transform_indices = @transform_8, window_bounds = array<i64: 1, 32>}, {transform_indices = @transform_9, window_bounds = array<i64: 1, 16, 32>}, {transform_indices = @transform_10, window_bounds = array<i64: 1, 16, 32>}, {transform_indices = @transform_11, window_bounds = array<i64: 1, 16, 32>}]} {
    %c0 = arith.constant 0 : index
    %c0_0 = arith.constant 0 : index
    %c0_1 = arith.constant 0 : index
    %0 = vector.load %arg2[%c0, %c0_0, %c0_1] : memref<1x16x32xf32, #tpu.memory_space<vmem>>, vector<1x16x32xf32>
    %1 = vector.shape_cast %0 : vector<1x16x32xf32> to vector<16x32xf32>
    %c0_2 = arith.constant 0 : index
    %c0_3 = arith.constant 0 : index
    %c0_4 = arith.constant 0 : index
    %2 = vector.load %arg3[%c0_2, %c0_3, %c0_4] : memref<1x16x32xf32, #tpu.memory_space<vmem>>, vector<1x16x32xf32>
    %3 = vector.shape_cast %2 : vector<1x16x32xf32> to vector<16x32xf32>
    %c0_5 = arith.constant 0 : index
    %c0_6 = arith.constant 0 : index
    %c0_7 = arith.constant 0 : index
    %4 = vector.load %arg4[%c0_5, %c0_6, %c0_7] : memref<1x16x32xf32, #tpu.memory_space<vmem>>, vector<1x16x32xf32>
    %5 = vector.shape_cast %4 : vector<1x16x32xf32> to vector<16x32xf32>
    %c0_8 = arith.constant 0 : index
    %c0_9 = arith.constant 0 : index
    %6 = vector.load %arg5[%c0_8, %c0_9] : memref<32x32xf32, #tpu.memory_space<vmem>>, vector<32x32xf32>
    %cst = arith.constant dense<0.000000e+00> : vector<16x32xf32>
    %7 = tpu.matmul %1, %6, %cst {dimension_numbers = #tpu.dot_dimension_numbers<[1], [0], [0], [1], [0, 0, 1, 1], [], []>} : vector<16x32xf32>, vector<32x32xf32>, vector<16x32xf32> -> vector<16x32xf32>
    %c0_10 = arith.constant 0 : index
    %c0_11 = arith.constant 0 : index
    %8 = vector.load %arg6[%c0_10, %c0_11] : memref<1x32xf32, #tpu.memory_space<vmem>>, vector<1x32xf32>
    %9 = vector.broadcast %8 : vector<1x32xf32> to vector<16x32xf32>
    %10 = arith.addf %7, %9 : vector<16x32xf32>
    %cst_12 = arith.constant 0.353553385 : f32
    %11 = vector.broadcast %cst_12 : f32 to vector<16x32xf32>
    %12 = arith.mulf %10, %11 : vector<16x32xf32>
    %c0_13 = arith.constant 0 : index
    %c0_14 = arith.constant 0 : index
    %c0_15 = arith.constant 0 : index
    %13 = vector.load %arg11[%c0_13, %c0_14, %c0_15] : memref<1x16x32xf32, #tpu.memory_space<vmem>>, vector<1x16x32xf32>
    %14 = vector.shape_cast %13 : vector<1x16x32xf32> to vector<16x32xf32>
    %15 = vector.shape_cast %12 : vector<16x32xf32> to vector<1x16x32xf32>
    tpu.vector_store %arg11[%c0_13, %c0_14, %c0_15], %15 {strides = array<i32>} : memref<1x16x32xf32, #tpu.memory_space<vmem>>, vector<1x16x32xf32>,
    %c0_16 = arith.constant 0 : index
    %c0_17 = arith.constant 0 : index
    %16 = vector.load %arg7[%c0_16, %c0_17] : memref<32x32xf32, #tpu.memory_space<vmem>>, vector<32x32xf32>
    %cst_18 = arith.constant dense<0.000000e+00> : vector<16x32xf32>
    %17 = tpu.matmul %3, %16, %cst_18 {dimension_numbers = #tpu.dot_dimension_numbers<[1], [0], [0], [1], [0, 0, 1, 1], [], []>} : vector<16x32xf32>, vector<32x32xf32>, vector<16x32xf32> -> vector<16x32xf32>
    %c0_19 = arith.constant 0 : index
    %c0_20 = arith.constant 0 : index
    %18 = vector.load %arg8[%c0_19, %c0_20] : memref<1x32xf32, #tpu.memory_space<vmem>>, vector<1x32xf32>
    %19 = vector.broadcast %18 : vector<1x32xf32> to vector<16x32xf32>
    %20 = arith.addf %17, %19 : vector<16x32xf32>
    %c0_21 = arith.constant 0 : index
    %c0_22 = arith.constant 0 : index
    %c0_23 = arith.constant 0 : index
    %21 = vector.load %arg12[%c0_21, %c0_22, %c0_23] : memref<1x16x32xf32, #tpu.memory_space<vmem>>, vector<1x16x32xf32>
    %22 = vector.shape_cast %21 : vector<1x16x32xf32> to vector<16x32xf32>
    %23 = vector.shape_cast %20 : vector<16x32xf32> to vector<1x16x32xf32>
    tpu.vector_store %arg12[%c0_21, %c0_22, %c0_23], %23 {strides = array<i32>} : memref<1x16x32xf32, #tpu.memory_space<vmem>>, vector<1x16x32xf32>,
    %c0_24 = arith.constant 0 : index
    %c0_25 = arith.constant 0 : index
    %24 = vector.load %arg9[%c0_24, %c0_25] : memref<32x32xf32, #tpu.memory_space<vmem>>, vector<32x32xf32>
    %cst_26 = arith.constant dense<0.000000e+00> : vector<16x32xf32>
    %25 = tpu.matmul %5, %24, %cst_26 {dimension_numbers = #tpu.dot_dimension_numbers<[1], [0], [0], [1], [0, 0, 1, 1], [], []>} : vector<16x32xf32>, vector<32x32xf32>, vector<16x32xf32> -> vector<16x32xf32>
    %c0_27 = arith.constant 0 : index
    %c0_28 = arith.constant 0 : index
    %26 = vector.load %arg10[%c0_27, %c0_28] : memref<1x32xf32, #tpu.memory_space<vmem>>, vector<1x32xf32>
    %27 = vector.broadcast %26 : vector<1x32xf32> to vector<16x32xf32>
    %28 = arith.addf %25, %27 : vector<16x32xf32>
    %c0_29 = arith.constant 0 : index
    %c0_30 = arith.constant 0 : index
    %c0_31 = arith.constant 0 : index
    %29 = vector.load %arg13[%c0_29, %c0_30, %c0_31] : memref<1x16x32xf32, #tpu.memory_space<vmem>>, vector<1x16x32xf32>
    %30 = vector.shape_cast %29 : vector<1x16x32xf32> to vector<16x32xf32>
    %31 = vector.shape_cast %28 : vector<16x32xf32> to vector<1x16x32xf32>
    tpu.vector_store %arg13[%c0_29, %c0_30, %c0_31], %31 {strides = array<i32>} : memref<1x16x32xf32, #tpu.memory_space<vmem>>, vector<1x16x32xf32>,
    return
  }
  func.func @transform_0(%arg0: i32, %arg1: i32) -> (i32, i32, i32) {
    %c0_i32 = arith.constant 0 : i32
    %c0_i32_0 = arith.constant 0 : i32
    return %arg0, %arg1, %c0_i32 : i32, i32, i32
  }
  func.func @transform_1(%arg0: i32, %arg1: i32) -> (i32, i32, i32) {
    %c0_i32 = arith.constant 0 : i32
    %c0_i32_0 = arith.constant 0 : i32
    return %arg0, %arg1, %c0_i32 : i32, i32, i32
  }
  func.func @transform_2(%arg0: i32, %arg1: i32) -> (i32, i32, i32) {
    %c0_i32 = arith.constant 0 : i32
    %c0_i32_0 = arith.constant 0 : i32
    return %arg0, %arg1, %c0_i32 : i32, i32, i32
  }
  func.func @transform_3(%arg0: i32, %arg1: i32) -> (i32, i32) {
    %c0_i32 = arith.constant 0 : i32
    %c0_i32_0 = arith.constant 0 : i32
    %c0_i32_1 = arith.constant 0 : i32
    return %c0_i32, %c0_i32_0 : i32, i32
  }
  func.func @transform_4(%arg0: i32, %arg1: i32) -> (i32, i32) {
    %c0_i32 = arith.constant 0 : i32
    %c0_i32_0 = arith.constant 0 : i32
    %c0_i32_1 = arith.constant 0 : i32
    return %c0_i32, %c0_i32_0 : i32, i32
  }
  func.func @transform_5(%arg0: i32, %arg1: i32) -> (i32, i32) {
    %c0_i32 = arith.constant 0 : i32
    %c0_i32_0 = arith.constant 0 : i32
    %c0_i32_1 = arith.constant 0 : i32
    return %c0_i32, %c0_i32_0 : i32, i32
  }
  func.func @transform_6(%arg0: i32, %arg1: i32) -> (i32, i32) {
    %c0_i32 = arith.constant 0 : i32
    %c0_i32_0 = arith.constant 0 : i32
    %c0_i32_1 = arith.constant 0 : i32
    return %c0_i32, %c0_i32_0 : i32, i32
  }
  func.func @transform_7(%arg0: i32, %arg1: i32) -> (i32, i32) {
    %c0_i32 = arith.constant 0 : i32
    %c0_i32_0 = arith.constant 0 : i32
    %c0_i32_1 = arith.constant 0 : i32
    return %c0_i32, %c0_i32_0 : i32, i32
  }
  func.func @transform_8(%arg0: i32, %arg1: i32) -> (i32, i32) {
    %c0_i32 = arith.constant 0 : i32
    %c0_i32_0 = arith.constant 0 : i32
    %c0_i32_1 = arith.constant 0 : i32
    return %c0_i32, %c0_i32_0 : i32, i32
  }
  func.func @transform_9(%arg0: i32, %arg1: i32) -> (i32, i32, i32) {
    %c0_i32 = arith.constant 0 : i32
    %c0_i32_0 = arith.constant 0 : i32
    return %arg0, %arg1, %c0_i32 : i32, i32, i32
  }
  func.func @transform_10(%arg0: i32, %arg1: i32) -> (i32, i32, i32) {
    %c0_i32 = arith.constant 0 : i32
    %c0_i32_0 = arith.constant 0 : i32
    return %arg0, %arg1, %c0_i32 : i32, i32, i32
  }
  func.func @transform_11(%arg0: i32, %arg1: i32) -> (i32, i32, i32) {
    %c0_i32 = arith.constant 0 : i32
    %c0_i32_0 = arith.constant 0 : i32
    return %arg0, %arg1, %c0_i32 : i32, i32, i32
  }
}

</mosaic_0001>

<bundles_post_ra>
// kernel: tpu_custom_call.1
= control target key start
LH: loop header
LB: loop body
LE: loop exit
PB: predicated region body
PF: predicated region fallthrough
CT: control target
= control target key end

     0   :  { %s2325_s0 = inlined_call_operand.hbm [shape: f32[2,16,32], index: 0, kind: input, shape index: {}]   ;;  %s2326_s1 = inlined_call_operand.hbm [shape: f32[2,16,32], index: 1, kind: input, shape index: {}]   ;;  %s2327_s2 = inlined_call_operand.hbm [shape: f32[2,16,32], index: 2, kind: input, shape index: {}]   ;;  %s2328_s3 = inlined_call_operand.hbm [shape: f32[32,32], index: 3, kind: input, shape index: {}]   ;;  %s2329_s4 = inlined_call_operand.vmem [shape: f32[1,32], index: 4, kind: input, shape index: {}]   ;;  %s2330_s5 = inlined_call_operand.hbm [shape: f32[32,32], index: 5, kind: input, shape index: {}]   ;;  %s2331_s6 = inlined_call_operand.vmem [shape: f32[1,32], index: 6, kind: input, shape index: {}]   ;;  %s2332_s7 = inlined_call_operand.hbm [shape: f32[32,32], index: 7, kind: input, shape index: {}]   ;;  %s2333_s8 = inlined_call_operand.vmem [shape: f32[1,32], index: 8, kind: input, shape index: {}]   ;;  %s2334_s9 = inlined_call_operand.hbm [shape: f32[2,16,32], index: 9, kind: output, shape index: {0}]   ;;  %s2335_s10 = inlined_call_operand.hbm [shape: f32[2,16,32], index: 10, kind: output, shape index: {1}]   ;;  %s2336_s11 = inlined_call_operand.hbm [shape: f32[2,16,32], index: 11, kind: output, shape index: {2}]  }
   0x1   :  { %2366 = sst [smem:[#allocation30_spill]] %s2326_s1 }
   0x2   :  { %2367 = sst [smem:[#allocation31_spill]] %s2328_s3 }
   0x3   :  { %2368 = sst [smem:[#allocation32_spill]] %s2329_s4 }
   0x4   :  { %2369 = sst [smem:[#allocation33_spill]] %s2331_s6 }
   0x5   :  { %2370 = sst [smem:[#allocation34_spill]] %s2333_s8 }
   0x6   :  { %2371 = sst [smem:[#allocation35_spill]] %s2334_s9 }
   0x7   :  { %2372 = sst [smem:[#allocation36_spill]] %s2335_s10 }
   0x8   :  { %2373 = sst [smem:[#allocation37_spill]] %s2336_s11 }
   0x9   :  { %17 = vsyncpa [#allocation3], 0 }
   0xa   :  { %19 = vsyncpa [#allocation3 + $0x1], 0 }
   0xb   :  { %20 = vsyncpa [#allocation6], 0 }
   0xc   :  { %22 = vsyncpa [#allocation6 + $0x1], 0 }
   0xd   :  { %23 = vsyncpa [#allocation9], 0 }
   0xe   :  { %24 = vsyncpa [#allocation12], 0 }
   0xf   :  { %25 = vsyncpa [#allocation4], 0 }
  0x10   :  { %27 = vsyncpa [#allocation4 + $0x1], 0 }
  0x11   :  { %28 = vsyncpa [#allocation15], 0 }
  0x12   :  { %30 = vsyncpa [#allocation15 + $0x1], 0  ;;  %s1812_s17 = smov 0   ;;  %s1814_s18 = smov 0  }
  0x13   :  { %s1816_s19 = smov 0   ;;  %s1818_s20 = smov 0  }
  0x14   :  { %s1820_s21 = smov 0   ;;  %s1822_s22 = smov 0  }
  0x15 LB: > { %2374 = sst [smem:[#allocation23_spill]] %s1717_s17  ;;  %s1843_s23 = sadd.s32 4294967295, %s1737_s22   ;;  %s1737_s22 = sphi %s1822_s22, %s36_s22   ;;  %s1733_s21 = sphi %s1820_s21, %s2423_s21   ;;  %s1729_s20 = sphi %s1818_s20, %s2422_s20   ;;  %s1725_s19 = sphi %s1816_s19, %s2426_s19   ;;  %s1721_s18 = sphi %s1814_s18, %s2425_s18   ;;  %s1717_s17 = sphi %s1812_s17, %s2424_s17  }
  0x16   : > { %2375 = sst [smem:[#allocation24_spill]] %s1733_s21  ;;  %s2337_s24 = sadd.s32 4294967294, %s1737_s22  }
  0x17   : > { %2376 = sst [smem:[#allocation25_spill]] %s1737_s22  ;;  %p64_p0 = scmp.ne.s32.totalorder %s1725_s19, %s1721_s18 }
  0x18   : > { %p65_p1 = scmp.eq.s32.totalorder %s1737_s22, 0  ;;  %p70_p2 = scmp.ne.s32.totalorder %s1721_s18, %s1717_s17 }
  0x19   : > { %p2342_p3 = scmp.eq.s32.totalorder %s1843_s23, 0  ;;  %p278_p5 = scmp.eq.s32.totalorder %s1843_s23, 1 }
  0x1a   : > { %p1852_p4 = por %p65_p1, %p64_p0  ;;  %p284_p7 = scmp.eq.s32.totalorder %s2337_s24, 1 }
  0x1b   : > { %p1859_p6 = por %p2342_p3, %p70_p2  ;;  %p1865_p8 = por %p278_p5, %p64_p0 }
  0x1c   : > { %p1167_p9 = scmp.ge.s32.totalorder %s1737_s22, 1  ;;  %p1870_p10 = por %p284_p7, %p70_p2 }
  0x1d   : > { %s2378_s26 = scalar_select %p1859_p6, 1, 0 }
  0x1e   : > { %s2379_s27 = scalar_select %p1865_p8, 1, 0 }
  0x1f   : > { %s2381_s28 = scalar_select %p1870_p10, 1, 0 }
  0x20   : > { %2380 = sst [smem:[#allocation26_spill]] %s2379_s27  ;;  %p347_p11 = scmp.lt.s32.totalorder %s1737_s22, 3 }
  0x21   : > { %2382 = sst [smem:[#allocation27_spill]] %s2381_s28  ;;  %s1739_s30 = smov [#allocation8]  }
  0x22   : > { %p1875_p12 = pnand %p1167_p9, %p347_p11  ;;  %s359_s12 = sshll.u32 %s1739_s30, 4  ;;  %s1879_s12 = int_to_ptr.vmem [resolvable:$true] %s359_s12 }
  0x23   : > { %s48_s14 = sadd.s32 1, %s1733_s21  ;;  %s2386_s3 = sld [smem:[#allocation31_spill]] }
  0x24   : > { %s2383_s29 = scalar_select %p1875_p12, 1, 0 }
  0x25   : > { %p1316_p13 = pneg %p1875_p12  ;;  %p1892_p2 = scmp.ge.s32.totalorder %s48_s14, 2 }
  0x27   : > { %p1886_p1 = pnand %p1316_p13, %p2342_p3 }
  0x29   : > { %s2384_s13 = scalar_select %p1886_p1, 1, 0 }
  0x2a   : > { %s1409_s30 = scalar_lea.hbm %s2386_s3, 512  ;;  %p1904_p7 = pneg %p1886_p1 }
  0x2b   : > { %p1410_p5 = scmp.ne.s32.totalorder %s2386_s3, %s1409_s30  ;;  %p1416_p13 = scmp.lt.u32.totalorder %s1409_s30, %s2386_s3 }
  0x2c   : > { %s2387_s8 = scalar_select %p1904_p7, 1, 0 }
  0x2d   : > { %p1412_p9 = pnand %p1904_p7, %p1410_p5 }
  0x2f   : > { %p1413_p11 = pneg %p1412_p9 }
  0x31   : > { %p1418_p0 = pnand %p1416_p13, %p1413_p11 }
  0x33   : > { %1421 = shalt.err (!%p1418_p0)
}
  0x34   : > { %s1422_s11 = scalar_lea.vmem %s1879_s12, 512  ;;  %p1430_p6 = scmp.lt.s32.totalorder %s1879_s12, %s1879_s12 }
  0x35   : > { %p1423_p3 = scmp.ne.s32.totalorder %s1879_s12, %s1422_s11  ;;  %p1431_p12 = scmp.lt.s32.totalorder %s1422_s11, %s1422_s11 }
  0x37   : > { %p1425_p10 = pnand %p1423_p3, %p1904_p7  ;;  %p1432_p5 = por %p1431_p12, %p1430_p6 }
  0x39   : > { %p1426_p8 = pneg %p1425_p10 }
  0x3b   : > { %p1433_p9 = pnand %p1432_p5, %p1426_p8 }
  0x3d   : > { %1436 = shalt.err (!%p1433_p9)
}
  0x3e   : > { %s2349_s17 = smov 128   ;;  %s2352_s9 = smov 8  }
  0x3f   : > { %1319 = dma.hbm_to_vmem [thread:$0]  (!%p1886_p1), %s2386_s3, 512, %s1879_s12, [#allocation9], %s2349_s17, %s2349_s17, %s2352_s9  }
  0x40   : > { %s2428_s14 = smov (%p1892_p2, %s48_s14), 0  ;;  %p1349_p3 = scmp.lt.s32.totalorder %s1737_s22, 2 }
  0x41   : > { %2388 = sst [smem:[#allocation28_spill]] %s2428_s14  ;;  %s2351_s15 = sand.u32 1, %s1725_s19  }
  0x42   : > { %s52_s30 = ssub.s32 %s1733_s21, %s2428_s14  ;;  %s1938_s11 = sshll.u32 %s2351_s15, 4 }
  0x43   : > { %p55_p6 = scmp.eq.s32.totalorder %s52_s30, 0  ;;  %s1941_s10 = sshll.u32 %s1733_s21, 8 }
  0x44   : > { %p1945_p8 = pnand %p1349_p3, %p1852_p4  ;;  %s431_s12 = sand.u32 1, %s1737_s22  }
  0x45   : > { %s2390_s16 = sadd.s32 1, %s1725_s19  ;;  %s2392_s1 = sld [smem:[#allocation30_spill]] }
  0x46   : > { %s2389_s27 = scalar_select %p1945_p8, 1, 0 }
  0x47   : > { %s1953_s24 = scalar_select %p55_p6, %s1725_s19, %s2390_s16  }
  0x48   : > { %s435_s25 = scalar_lea.vmem [#allocation5], %s1938_s11  ;;  %s1742_s9 = smov [#allocation10]  }
  0x49   : > { %2391 = sst [smem:[#allocation29_spill]] %s1953_s24  ;;  %s444_s30 = sshll.u32 %s435_s25, 4  ;;  %s1962_s30 = int_to_ptr.vmem [resolvable:$true] %s444_s30 }
  0x4a   : > { %s1964_s3 = sshll.u32 %s1742_s9, 4  ;;  %s1966_s14 = scalar_lea.sflag [#allocation6], %s431_s12  ;;  %s376_s3 = int_to_ptr.vmem [resolvable:$true] %s1964_s3 }
  0x4b   : > { %s1959_s15 = scalar_lea.hbm %s2392_s1, %s1941_s10  ;;  %p1972_p10 = pneg %p1945_p8 }
  0x4c   : > { %s1437_s16 = scalar_lea.hbm %s1959_s15, 256  ;;  %s1442_s21 = scalar_lea.hbm %s2392_s1, 512 }
  0x4d   : > { %p1438_p4 = scmp.ne.s32.totalorder %s1959_s15, %s1437_s16  ;;  %p1443_p2 = scmp.lt.u32.totalorder %s1959_s15, %s2392_s1 }
  0x4e   : > { %s2393_s17 = scalar_select %p1972_p10, 1, 0 }
  0x4f   : > { %p1440_p12 = pnand %p1972_p10, %p1438_p4  ;;  %p1444_p11 = scmp.lt.u32.totalorder %s1442_s21, %s1437_s16 }
  0x50   : > { %p1446_p5 = scmp.lt.u32.totalorder %s1437_s16, %s1959_s15 }
  0x51   : > { %p1441_p0 = pneg %p1440_p12  ;;  %p1445_p13 = por %p1444_p11, %p1443_p2 }
  0x53   : > { %p1447_p9 = por %p1446_p5, %p1445_p13 }
  0x55   : > { %p1448_p3 = pnand %p1447_p9, %p1441_p0 }
  0x57   : > { %1451 = shalt.err (!%p1448_p3)
}
  0x58   : > { %s1452_s12 = scalar_lea.vmem %s1962_s30, 256  ;;  %s1743_s28 = smov [#allocation5]  }
  0x59   : > { %p1453_p6 = scmp.ne.s32.totalorder %s1962_s30, %s1452_s12  ;;  %s1457_s25 = sshll.u32 %s1743_s28, 4  ;;  %s1458_s25 = int_to_ptr.vmem [resolvable:$false] %s1457_s25 }
  0x5a   : > { %s1459_s24 = scalar_lea.vmem %s1458_s25, 512  ;;  %p1460_p1 = scmp.lt.s32.totalorder %s1962_s30, %s1458_s25 }
  0x5b   : > { %p1455_p4 = pnand %p1453_p6, %p1972_p10  ;;  %p1461_p7 = scmp.lt.s32.totalorder %s1459_s24, %s1452_s12 }
  0x5d   : > { %p1456_p12 = pneg %p1455_p4  ;;  %p1462_p2 = por %p1461_p7, %p1460_p1 }
  0x5f   : > { %p1463_p11 = pnand %p1462_p2, %p1456_p12 }
  0x61   : > { %1466 = shalt.err (!%p1463_p11)
}
  0x62   : > { %s2394_s21 = smov 8   ;;  %s2395_s16 = smov 128  }
  0x63   : > { %1332 = dma.hbm_to_vmem [thread:$0]  (!%p1945_p8), %s1959_s15, 256, %s1962_s30, %s1966_s14, %s2395_s16, %s2395_s16, %s2394_s21  }
  0x64   : > { %s1467_s25 = scalar_lea.hbm %s2330_s5, 512  ;;  %p2396_p7 = scmp.ne.s32.totalorder %s2387_s8, 0 }
  0x65   : > { %p1468_p1 = scmp.ne.s32.totalorder %s2330_s5, %s1467_s25  ;;  %p1474_p5 = scmp.lt.u32.totalorder %s1467_s25, %s2330_s5 }
  0x67   : > { %p1470_p0 = pnand %p1468_p1, %p2396_p7 }
  0x69   : > { %p1471_p13 = pneg %p1470_p0 }
  0x6b   : > { %p1476_p9 = pnand %p1474_p5, %p1471_p13 }
  0x6d   : > { %1479 = shalt.err (!%p1476_p9)
}
  0x6e   : > { %s1480_s6 = scalar_lea.vmem %s376_s3, 512  ;;  %p1488_p12 = scmp.lt.s32.totalorder %s376_s3, %s376_s3 }
  0x6f   : > { %p1481_p3 = scmp.ne.s32.totalorder %s376_s3, %s1480_s6  ;;  %p1489_p2 = scmp.lt.s32.totalorder %s1480_s6, %s1480_s6 }
  0x71   : > { %p1483_p6 = pnand %p1481_p3, %p2396_p7  ;;  %p1490_p11 = por %p1489_p2, %p1488_p12 }
  0x73   : > { %p1484_p4 = pneg %p1483_p6 }
  0x75   : > { %p1491_p8 = pnand %p1490_p11, %p1484_p4 }
  0x77   : > { %1494 = shalt.err (!%p1491_p8)
}
  0x78   : > { %p2397_p1 = scmp.ne.s32.totalorder %s2384_s13, 0  ;;  %s1744_s15 = smov [#allocation11]  }
  0x79   : > { %s391_s30 = sshll.u32 %s1744_s15, 4  ;;  %s1495_s6 = scalar_lea.hbm %s2332_s7, 512  ;;  %s392_s30 = int_to_ptr.vmem [resolvable:$true] %s391_s30 }
  0x7a   : > { %1322 = dma.hbm_to_vmem [thread:$0]  (!%p2397_p1), %s2330_s5, 512, %s376_s3, [#allocation9], %s2395_s16, %s2395_s16, %s2394_s21  }
  0x7b   : > { %p1496_p8 = scmp.ne.s32.totalorder %s2332_s7, %s1495_s6  ;;  %p1502_p5 = scmp.lt.u32.totalorder %s1495_s6, %s2332_s7 }
  0x7d   : > { %p1498_p0 = pnand %p1496_p8, %p2396_p7 }
  0x7f   : > { %p1499_p13 = pneg %p1498_p0 }
  0x81   : > { %p1504_p9 = pnand %p1502_p5, %p1499_p13 }
  0x83   : > { %1507 = shalt.err (!%p1504_p9)
}
  0x84   : > { %s1508_s3 = scalar_lea.vmem %s392_s30, 512  ;;  %p1516_p12 = scmp.lt.s32.totalorder %s392_s30, %s392_s30 }
  0x85   : > { %p1509_p3 = scmp.ne.s32.totalorder %s392_s30, %s1508_s3  ;;  %p1517_p2 = scmp.lt.s32.totalorder %s1508_s3, %s1508_s3 }
  0x87   : > { %p1511_p6 = pnand %p1509_p3, %p2396_p7  ;;  %p1518_p11 = por %p1517_p2, %p1516_p12 }
  0x89   : > { %p1512_p4 = pneg %p1511_p6 }
  0x8b   : > { %p1519_p10 = pnand %p1518_p11, %p1512_p4 }
  0x8d   : > { %1522 = shalt.err (!%p1519_p10)
}
  0x8e   : > { %1325 = dma.hbm_to_vmem [thread:$0]  (!%p2397_p1), %s2332_s7, 512, %s392_s30, [#allocation12], %s2395_s16, %s2395_s16, %s2394_s21  }
  0x8f   : > { %s2046_s15 = scalar_lea.hbm %s2325_s0, %s1941_s10  ;;  %s412_s13 = scalar_lea.vmem [#allocation2], %s1938_s11 }
  0x90   : > { %s421_s9 = sshll.u32 %s412_s13, 4  ;;  %s2398_s28 = sand.u32 1, %s1725_s19   ;;  %s2049_s9 = int_to_ptr.vmem [resolvable:$true] %s421_s9 }
  0x91   : > { %s2053_s6 = scalar_lea.sflag [#allocation3], %s2398_s28  ;;  %s1523_s25 = scalar_lea.hbm %s2046_s15, 256 }
  0x92   : > { %p1524_p10 = scmp.ne.s32.totalorder %s2046_s15, %s1523_s25  ;;  %p2399_p7 = scmp.ne.s32.totalorder %s2393_s17, 0 }
  0x93   : > { %s1528_s24 = scalar_lea.hbm %s2325_s0, 512  ;;  %p1529_p0 = scmp.lt.u32.totalorder %s2046_s15, %s2325_s0 }
  0x94   : > { %p1526_p1 = pnand %p1524_p10, %p2399_p7  ;;  %p1530_p13 = scmp.lt.u32.totalorder %s1528_s24, %s1523_s25 }
  0x95   : > { %p1532_p9 = scmp.lt.u32.totalorder %s1523_s25, %s2046_s15 }
  0x96   : > { %p1527_p8 = pneg %p1526_p1  ;;  %p1531_p5 = por %p1530_p13, %p1529_p0 }
  0x98   : > { %p1533_p3 = por %p1532_p9, %p1531_p5 }
  0x9a   : > { %p1534_p6 = pnand %p1533_p3, %p1527_p8 }
  0x9c   : > { %1537 = shalt.err (!%p1534_p6)
}
  0x9d   : > { %s1538_s1 = scalar_lea.vmem %s2049_s9, 256  ;;  %s1745_s8 = smov [#allocation2]  }
  0x9e   : > { %p1539_p4 = scmp.ne.s32.totalorder %s2049_s9, %s1538_s1  ;;  %s1543_s22 = sshll.u32 %s1745_s8, 4  ;;  %s1544_s22 = int_to_ptr.vmem [resolvable:$false] %s1543_s22 }
  0x9f   : > { %s1545_s13 = scalar_lea.vmem %s1544_s22, 512  ;;  %p1546_p11 = scmp.lt.s32.totalorder %s2049_s9, %s1544_s22 }
  0xa0   : > { %p1541_p12 = pnand %p1539_p4, %p2399_p7  ;;  %p1547_p10 = scmp.lt.s32.totalorder %s1545_s13, %s1538_s1 }
  0xa2   : > { %p1542_p2 = pneg %p1541_p12  ;;  %p1548_p1 = por %p1547_p10, %p1546_p11 }
  0xa4   : > { %p1549_p0 = pnand %p1548_p1, %p1542_p2 }
  0xa6   : > { %1552 = shalt.err (!%p1549_p0)
}
  0xa7   : > { %p2400_p8 = scmp.ne.s32.totalorder %s2389_s27, 0  ;;  %s2084_s30 = scalar_lea.hbm %s2327_s2, %s1941_s10 }
  0xa8   : > { %s458_s12 = scalar_lea.vmem [#allocation7], %s1938_s11  ;;  %s1553_s3 = scalar_lea.hbm %s2084_s30, 256 }
  0xa9   : > { %1329 = dma.hbm_to_vmem [thread:$0]  (!%p2400_p8), %s2046_s15, 256, %s2049_s9, %s2053_s6, %s2395_s16, %s2395_s16, %s2394_s21  }
  0xaa   : > { %s467_s24 = sshll.u32 %s458_s12, 4  ;;  %p1554_p13 = scmp.ne.s32.totalorder %s2084_s30, %s1553_s3  ;;  %s2087_s24 = int_to_ptr.vmem [resolvable:$true] %s467_s24 }
  0xab   : > { %s1558_s9 = scalar_lea.hbm %s2327_s2, 512  ;;  %p1559_p3 = scmp.lt.u32.totalorder %s2084_s30, %s2327_s2 }
  0xac   : > { %p1556_p5 = pnand %p1554_p13, %p2399_p7  ;;  %p1560_p6 = scmp.lt.u32.totalorder %s1558_s9, %s1553_s3 }
  0xad   : > { %p1562_p12 = scmp.lt.u32.totalorder %s1553_s3, %s2084_s30 }
  0xae   : > { %p1557_p9 = pneg %p1556_p5  ;;  %p1561_p4 = por %p1560_p6, %p1559_p3 }
  0xb0   : > { %p1563_p2 = por %p1562_p12, %p1561_p4 }
  0xb2   : > { %p1564_p11 = pnand %p1563_p2, %p1557_p9 }
  0xb4   : > { %1567 = shalt.err (!%p1564_p11)
}
  0xb5   : > { %s1568_s11 = scalar_lea.vmem %s2087_s24, 256  ;;  %s1746_s1 = smov [#allocation7]  }
  0xb6   : > { %p1569_p10 = scmp.ne.s32.totalorder %s2087_s24, %s1568_s11  ;;  %s1573_s8 = sshll.u32 %s1746_s1, 4  ;;  %s1574_s8 = int_to_ptr.vmem [resolvable:$false] %s1573_s8 }
  0xb7   : > { %s1575_s22 = scalar_lea.vmem %s1574_s8, 512  ;;  %p1576_p13 = scmp.lt.s32.totalorder %s2087_s24, %s1574_s8 }
  0xb8   : > { %p1571_p1 = pnand %p1569_p10, %p2399_p7  ;;  %p1577_p5 = scmp.lt.s32.totalorder %s1575_s22, %s1568_s11 }
  0xba   : > { %p1572_p0 = pneg %p1571_p1  ;;  %p1578_p3 = por %p1577_p5, %p1576_p13 }
  0xbc   : > { %p1579_p6 = pnand %p1578_p3, %p1572_p0 }
  0xbe   : > { %1582 = shalt.err (!%p1579_p6)
}
  0xbf   : > { %1335 = dma.hbm_to_vmem [thread:$0]  (!%p2400_p8), %s2084_s30, 256, %s2087_s24, %s1966_s14, %s2395_s16, %s2395_s16, %s2394_s21  }
  0xc0   : > { %p2401_p7 = scmp.ne.s32.totalorder %s2383_s29, 0 }
  0xc1   : > { %s2117_s17 = sand.u32 (!%p2401_p7), 1, %s1721_s18   ;;  %p2402_p9 = scmp.ne.s32.totalorder (!%p2401_p7), %s2378_s26, 0 }
  0xc2   : > { %479 = sbr.rel (%p2401_p7) target bundleno = 509 (0x1fd), region = 56  ;;  %s2120_s13 = sshll.u32 (!%p2401_p7), %s2117_s17, 4 }
  0xc3   : > { %s482_s27 = scalar_lea.sflag (!%p2401_p7), [#allocation3], %s2117_s17  ;;  %s485_s28 = scalar_lea.vmem (!%p2401_p7), [#allocation2], %s2120_s13 }
  0xc9   : > { %1692 = dma.done.wait (%p2402_p9), %s482_s27, 256  }
  0xca   : > { %1694 = vsyncadd (%p2402_p9), %s482_s27, 4294967040  ;;  %s490_s29 = sand.u32 1, %s1843_s23   ;;  %s494_s21 = scalar_lea.vmem [#allocation5], %s2120_s13 }
  0xcb   : > { %s491_s14 = scalar_lea.sflag [#allocation6], %s490_s29 }
  0xcc   : > { %1696 = dma.done.wait (%p2402_p9), %s491_s14, 512  }
  0xcd   : > { %1698 = vsyncadd (%p2402_p9), %s491_s14, 4294966784  ;;  %s503_s16 = scalar_lea.vmem [#allocation7], %s2120_s13  ;;  %p2403_p8 = scmp.eq.s32.totalorder %s1843_s23, 0 }
  0xcf   : > { %1700 = dma.done.wait (%p2403_p8), [#allocation9], 1024   ;;  %p2404_p4 = pmov %p2403_p8 }
  0xd1   : > { %1702 = vsyncadd (%p2404_p4), [#allocation9], 4294966272  ;;  %p2405_p12 = pmov %p2404_p4 }
  0xd2   : > { %p2406_p2 = pmov %p2404_p4 }
  0xd3   : > { %1704 = dma.done.wait (%p2405_p12), [#allocation12], 512  }
  0xd4   : > { %1706 = vsyncadd (%p2406_p2), [#allocation12], 4294966784  ;;  %v586_v0 = vld [vmem:[#allocation8] sm:$0xff]  ;;  %v587_v1 = vld [vmem:[#allocation8 + $0x8] sm:$0xff]  ;;  %vm597_vm0 = vcmask 261120   ;;  %s2407_s30 = sld [smem:[#allocation32_spill]] }
  0xd5   : > { %v588_v2 = vld [vmem:[#allocation8 + $0x10] sm:$0xff]  ;;  %v1268_v3 = vpack.c.bf16 %v587_v1, %v586_v0  ;;  %v589_v4 = vld [vmem:[#allocation8 + $0x18] sm:$0xff]  ;;  %v683_v5 = vld [vmem:[#allocation10] sm:$0xff]  ;;  %s566_s12 = scalar_lea.vmem [#allocation14], %s2120_s13  ;;  %s559_s3 = scalar_lea.vmem [#allocation13], %s2120_s13 }
  0xd6   : > { %v684_v6 = vld [vmem:[#allocation10 + $0x8] sm:$0xff]  ;;  %v1272_v7 = vpack.c.bf16 %v589_v4, %v588_v2  ;;  %v580_v9 = vld [vmem:[%s485_s28] sm:$0xff]  ;;  %v686_v13 = vld [vmem:[#allocation10 + $0x18] sm:$0xff]  ;;  %s915_s24 = sshll.u32 %s566_s12, 4  ;;  %s897_s4 = sshll.u32 %s559_s3, 4  ;;  %s2174_s24 = int_to_ptr.vmem [resolvable:$true] %s915_s24  ;;  %s2189_s4 = int_to_ptr.vmem [resolvable:$true] %s897_s4 }
  0xd7   : > { %v1276_v8 = vpack.c.bf16 %v684_v6, %v683_v5  ;;  %v777_v10 = vld [vmem:[#allocation11] sm:$0xff]  ;;  %1269 = vmatprep.subr.bf16.mxu0 %v1268_v3  ;;  %1243 = vmatprep.mubr.msk.f32.mxu0 %vm597_vm0, %v580_v9  ;;  %v778_v11 = vld [vmem:[#allocation11 + $0x8] sm:$0xff]  ;;  %v685_v12 = vld [vmem:[#allocation10 + $0x10] sm:$0xff]  ;;  %s2408_s6 = sld [smem:[#allocation33_spill]]  ;;  %s2172_s10 = sshll.u32 %s1729_s20, 8 }
  0xd8   : > { %1271 = vmatpush3.bf16.msra.mxu0 %v1268_v3  ;;  %v1280_v14 = vpack.c.bf16 %v686_v13, %v685_v12  ;;  %v582_v15 = vld [vmem:[%s494_s21] sm:$0xff]  ;;  %v1284_v16 = vpack.c.bf16 %v778_v11, %v777_v10  ;;  %v780_v18 = vld [vmem:[#allocation11 + $0x18] sm:$0xff]  ;;  %s2409_s11 = sld [smem:[#allocation26_spill]]  ;;  %s2410_s8 = sld [smem:[#allocation36_spill]] }
  0xd9   : > { %1277 = vmatprep.subr.bf16.mxu1 %v1276_v8  ;;  %1273 = vmatprep.subr.bf16.mxu0 %v1272_v7  ;;  %v779_v17 = vld [vmem:[#allocation11 + $0x10] sm:$0xff]  ;;  %v581_v19 = vld [vmem:[%s485_s28 + $0x8] sm:$0xff]  ;;  %s2411_s14 = sld [smem:[#allocation35_spill]]  ;;  %s2412_s25 = sld [smem:[#allocation34_spill]] }
  0xda   : > { %1279 = vmatpush3.bf16.msra.mxu1 %v1276_v8  ;;  %1254 = vmatprep.mubr.msk.f32.mxu1 %vm597_vm0, %v582_v15  ;;  %v1288_v20 = vpack.c.bf16 %v780_v18, %v779_v17  ;;  %v583_v21 = vld [vmem:[%s494_s21 + $0x8] sm:$0xff]  ;;  %v584_v22 = vld [vmem:[%s503_s16] sm:$0xff]  ;;  %s2205_s9 = scalar_lea.sflag [#allocation15], %s490_s29 }
  0xdb   : > { %1281 = vmatprep.subr.bf16.mxu1 %v1280_v14  ;;  %v585_v23 = vld [vmem:[%s503_s16 + $0x8] sm:$0xff]  ;;  %v1191_v24 = vld [vmem:[%s2407_s30] ss:$0 sm:$0xff]  ;;  %s2199_s30 = scalar_lea.vmem [#allocation16], %s2120_s13 }
  0xdc   : > { %1275 = vmatpush3.bf16.msra.mxu0 %v1272_v7  ;;  %s933_s15 = sshll.u32 %s2199_s30, 4  ;;  %s2262_s15 = int_to_ptr.vmem [resolvable:$true] %s933_s15 }
  0xdd   : > { %1285 = vmatprep.subr.bf16.mxu0 %v1284_v16  ;;  %v1194_v25 = vld [vmem:[%s2408_s6] ss:$0 sm:$0xff]  ;;  %s1583_s6 = scalar_lea.vmem %s2174_s24, 256 }
  0xde   : > { %1283 = vmatpush3.bf16.msra.mxu1 %v1280_v14  ;;  %s2180_s22 = scalar_lea.hbm %s2410_s8, %s2172_s10  ;;  %p1584_p11 = scmp.ne.s32.totalorder %s2174_s24, %s1583_s6 }
  0xdf   : > { %1244 = vmatmul.mubr.msk.f32.vlgmr.msra.gmra.mrb[0].mxu0 %vm597_vm0, %v581_v19  ;;  %s2187_s21 = scalar_lea.hbm %s2411_s14, %s2172_s10  ;;  %v2196_v36 = vld [vmem:[%s2412_s25] ss:$0 sm:$0xff]  ;;  %p2413_p10 = scmp.ne.s32.totalorder %s2409_s11, 0 }
  0xe0   : > { %1287 = vmatpush3.bf16.msra.mxu0 %v1284_v16  ;;  %1265 = vmatprep.mubr.msk.f32.mxu0 %vm597_vm0, %v584_v22 }
  0xe1   : > { %1255 = vmatmul.mubr.msk.f32.vlgmr.msra.gmra.mrb[0].mxu1 %vm597_vm0, %v583_v21  ;;  %1289 = vmatprep.subr.bf16.mxu0 %v1288_v20  ;;  %p1585_p1 = pnand %p1584_p11, %p2413_p10 }
  0xe3   : > { %p1586_p0 = pneg %p1585_p1 }
  0xe4   : > { %1291 = vmatpush3.bf16.msra.mxu0 %v1288_v20 }
  0xe7   : > { %1266 = vmatmul.mubr.msk.f32.vlgmr.msra.gmra.mrb[2].mxu0 %vm597_vm0, %v585_v23 }
 0x1b2   : > { %v1245_v26 = vpop.f32.mrb[0].mxu0 }
 0x1b3   : > { %v676_v27 = vadd.f32 %v1245_v26, %v1191_v24  ;;  %v670_v28 = vpop.f32.mrb[1].mxu0 }
 0x1b4   : > { %v1256_v29 = vpop.f32.mrb[0].mxu1  ;;  %v671_v30 = vadd.f32 %v1191_v24, %v670_v28 }
 0x1b5   : > { %v772_v31 = vadd.f32 %v1256_v29, %v1194_v25  ;;  %v766_v32 = vpop.f32.mrb[1].mxu1  ;;  %v680_v33 = vmul.f32 0.35355338, %v676_v27 }
 0x1b6   : > { %v767_v34 = vadd.f32 %v1194_v25, %v766_v32  ;;  %v679_v35 = vmul.f32 0.35355338, %v671_v30 }
 0x1b7   : > { %776 = vst.msk [vmem:[%s566_s12 + $0x8] sm:$0xff] %vm597_vm0, %v772_v31  ;;  %682 = vst.msk [vmem:[%s559_s3 + $0x8] sm:$0xff] %vm597_vm0, %v680_v33 }
 0x1b8   : > { %775 = vst.msk [vmem:[%s566_s12] sm:$0xff] %vm597_vm0, %v767_v34  ;;  %681 = vst.msk [vmem:[%s559_s3] sm:$0xff] %vm597_vm0, %v679_v35  ;;  %s1747_s12 = smov [#allocation14]  }
 0x1b9   : > { %s1587_s1 = sshll.u32 %s1747_s12, 4  ;;  %s1588_s1 = int_to_ptr.vmem [resolvable:$false] %s1587_s1 }
 0x1ba   : > { %s1589_s20 = scalar_lea.vmem %s1588_s1, 512  ;;  %p1590_p13 = scmp.lt.s32.totalorder %s2174_s24, %s1588_s1 }
 0x1bb   : > { %p1591_p5 = scmp.lt.s32.totalorder %s1589_s20, %s1583_s6 }
 0x1bd   : > { %p1592_p3 = por %p1591_p5, %p1590_p13 }
 0x1bf   : > { %p1593_p6 = pnand %p1592_p3, %p1586_p0 }
 0x1c1   : > { %1596 = shalt.err (!%p1593_p6)
}
 0x1c2   : > { %s1597_s23 = scalar_lea.hbm %s2180_s22, 256  ;;  %s1601_s3 = scalar_lea.hbm %s2410_s8, 512 }
 0x1c3   : > { %p1598_p7 = scmp.ne.s32.totalorder %s2180_s22, %s1597_s23  ;;  %p1602_p4 = scmp.lt.u32.totalorder %s2180_s22, %s2410_s8 }
 0x1c4   : > { %p1603_p12 = scmp.lt.u32.totalorder %s1601_s3, %s1597_s23  ;;  %p1605_p11 = scmp.lt.u32.totalorder %s1597_s23, %s2180_s22 }
 0x1c5   : > { %p1599_p9 = pnand %p1598_p7, %p2413_p10 }
 0x1c6   : > { %p1604_p2 = por %p1603_p12, %p1602_p4 }
 0x1c7   : > { %p1600_p8 = pneg %p1599_p9 }
 0x1c8   : > { %p1606_p1 = por %p1605_p11, %p1604_p2 }
 0x1ca   : > { %p1607_p0 = pnand %p1606_p1, %p1600_p8 }
 0x1cc   : > { %1610 = shalt.err (!%p1607_p0)
}
 0x1cd   : > { %s1748_s16 = smov 128   ;;  %s1749_s26 = smov 8  }
 0x1ce   : > { %1311 = dma.vmem_to_hbm [thread:$0]  (%p2413_p10), %s2174_s24, 256, %s2180_s22, %s2205_s9, %s1748_s16, %s1748_s16, %s1749_s26  }
 0x1cf   : > { %s872_s25 = scalar_lea.sflag [#allocation4], %s2117_s17  ;;  %s1611_s6 = scalar_lea.vmem %s2189_s4, 256 }
 0x1d0   : > { %p1612_p13 = scmp.ne.s32.totalorder %s2189_s4, %s1611_s6  ;;  %s1750_s12 = smov [#allocation13]  }
 0x1d1   : > { %s1615_s1 = sshll.u32 %s1750_s12, 4  ;;  %s1616_s1 = int_to_ptr.vmem [resolvable:$false] %s1615_s1 }
 0x1d2   : > { %p1613_p5 = pnand %p1612_p13, %p2413_p10  ;;  %s1617_s20 = scalar_lea.vmem %s1616_s1, 512 }
 0x1d3   : > { %p1618_p6 = scmp.lt.s32.totalorder %s2189_s4, %s1616_s1  ;;  %p1619_p7 = scmp.lt.s32.totalorder %s1617_s20, %s1611_s6 }
 0x1d4   : > { %p1614_p3 = pneg %p1613_p5 }
 0x1d5   : > { %p1620_p9 = por %p1619_p7, %p1618_p6 }
 0x1d7   : > { %p1621_p8 = pnand %p1620_p9, %p1614_p3 }
 0x1d9   : > { %1624 = shalt.err (!%p1621_p8)
}
 0x1da   : > { %s1625_s24 = scalar_lea.hbm %s2187_s21, 256  ;;  %s1629_s13 = scalar_lea.hbm %s2411_s14, 512 }
 0x1db   : > { %p1626_p4 = scmp.ne.s32.totalorder %s2187_s21, %s1625_s24  ;;  %p1630_p11 = scmp.lt.u32.totalorder %s2187_s21, %s2411_s14 }
 0x1dc   : > { %p1631_p1 = scmp.lt.u32.totalorder %s1629_s13, %s1625_s24  ;;  %p1633_p13 = scmp.lt.u32.totalorder %s1625_s24, %s2187_s21 }
 0x1dd   : > { %p1627_p12 = pnand %p1626_p4, %p2413_p10 }
 0x1de   : > { %p1632_p0 = por %p1631_p1, %p1630_p11 }
 0x1df   : > { %p1628_p2 = pneg %p1627_p12 }
 0x1e0   : > { %p1634_p5 = por %p1633_p13, %p1632_p0 }
 0x1e2   : > { %p1635_p3 = pnand %p1634_p5, %p1628_p2 }
 0x1e4   : > { %1638 = shalt.err (!%p1635_p3)
}
 0x1e5   : > { %1310 = dma.vmem_to_hbm [thread:$0]  (%p2413_p10), %s2189_s4, 256, %s2187_s21, %s872_s25, %s1748_s16, %s1748_s16, %s1749_s26   ;;  %v1267_v37 = vpop.f32.mrb[2].mxu0 }
 0x1e6   : > { %v866_v38 = vadd.f32 %v1267_v37, %v2196_v36  ;;  %v860_v39 = vpop.f32.mrb[3].mxu0  ;;  %s2414_s28 = sld [smem:[#allocation37_spill]]  ;;  %s1639_s4 = scalar_lea.vmem %s2262_s15, 256 }
 0x1e7   : > { %v861_v40 = vadd.f32 %v2196_v36, %v860_v39  ;;  %p1640_p6 = scmp.ne.s32.totalorder %s2262_s15, %s1639_s4  ;;  %s1751_s21 = smov [#allocation16]  }
 0x1e8   : > { %870 = vst.msk [vmem:[%s2199_s30 + $0x8] sm:$0xff] %vm597_vm0, %v866_v38  ;;  %s1643_s25 = sshll.u32 %s1751_s21, 4  ;;  %s1644_s25 = int_to_ptr.vmem [resolvable:$false] %s1643_s25 }
 0x1e9   : > { %869 = vst.msk [vmem:[%s2199_s30] sm:$0xff] %vm597_vm0, %v861_v40  ;;  %p1641_p7 = pnand %p1640_p6, %p2413_p10  ;;  %s1645_s12 = scalar_lea.vmem %s1644_s25, 512 }
 0x1ea   : > { %p1646_p8 = scmp.lt.s32.totalorder %s2262_s15, %s1644_s25  ;;  %p1647_p4 = scmp.lt.s32.totalorder %s1645_s12, %s1639_s4 }
 0x1eb   : > { %p1642_p9 = pneg %p1641_p7 }
 0x1ec   : > { %s2269_s6 = scalar_lea.hbm %s2414_s28, %s2172_s10  ;;  %p1648_p12 = por %p1647_p4, %p1646_p8 }
 0x1ee   : > { %p1649_p2 = pnand %p1648_p12, %p1642_p9 }
 0x1f0   : > { %1652 = shalt.err (!%p1649_p2)
}
 0x1f1   : > { %s1653_s10 = scalar_lea.hbm %s2269_s6, 256  ;;  %s1657_s20 = scalar_lea.hbm %s2414_s28, 512 }
 0x1f2   : > { %p1654_p11 = scmp.ne.s32.totalorder %s2269_s6, %s1653_s10  ;;  %p1658_p13 = scmp.lt.u32.totalorder %s2269_s6, %s2414_s28 }
 0x1f3   : > { %p1659_p5 = scmp.lt.u32.totalorder %s1657_s20, %s1653_s10  ;;  %p1661_p6 = scmp.lt.u32.totalorder %s1653_s10, %s2269_s6 }
 0x1f4   : > { %p1655_p1 = pnand %p1654_p11, %p2413_p10 }
 0x1f5   : > { %p1660_p3 = por %p1659_p5, %p1658_p13 }
 0x1f6   : > { %p1656_p0 = pneg %p1655_p1 }
 0x1f7   : > { %p1662_p7 = por %p1661_p6, %p1660_p3 }
 0x1f9   : > { %p1663_p9 = pnand %p1662_p7, %p1656_p0 }
 0x1fb   : > { %1666 = shalt.err (!%p1663_p9)
}
 0x1fc   : > { %1312 = dma.vmem_to_hbm [thread:$0]  (%p2413_p10), %s2262_s15, 256, %s2269_s6, %s2205_s9, %s1748_s16, %s1748_s16, %s1749_s26  }
 0x1fd PF: > { %s2415_s23 = sld [smem:[#allocation23_spill]]  ;;  %s2416_s13 = sld [smem:[#allocation27_spill]] }
 0x1fe   : > { %s2417_s29 = sld [smem:[#allocation25_spill]] }
 0x203   : > { %s948_s3 = sand.u32 1, %s2415_s23   ;;  %p2418_p8 = scmp.ne.s32.totalorder %s2416_s13, 0 }
 0x204   : > { %p2419_p4 = scmp.ge.s32.totalorder %s2417_s29, 2  ;;  %s949_s17 = scalar_lea.sflag [#allocation4], %s948_s3 }
 0x206   : > { %p1337_p12 = pnand %p2419_p4, %p2418_p8 }
 0x208   : > { %1708 = dma.done.wait (!%p1337_p12), %s949_s17, 256  }
 0x209   : > { %1710 = vsyncadd (!%p1337_p12), %s949_s17, 4294967040  ;;  %s2420_s11 = sadd.s32 4294967294, %s2417_s29  }
 0x20a   : > { %s957_s27 = sand.u32 1, %s2420_s11  }
 0x20b   : > { %s958_s4 = scalar_lea.sflag [#allocation15], %s957_s27 }
 0x20c   : > { %1712 = dma.done.wait (!%p1337_p12), %s958_s4, 512  }
 0x20d   : > { %1714 = vsyncadd (!%p1337_p12), %s958_s4, 4294966784  ;;  %s36_s22 = sadd.s32 1, %s2417_s29   ;;  %s2421_s15 = sld [smem:[#allocation29_spill]] }
 0x20e   : > { %p33_p10 = scmp.ge.s32.totalorder %s36_s22, 4   ;;  %s2422_s20 = sld [smem:[#allocation24_spill]] }
 0x20f   : > { %s2423_s21 = sld [smem:[#allocation28_spill]]  ;;  %s2424_s17 = smov %s1721_s18 }
 0x210   : > { %s2425_s18 = smov %s1725_s19  ;;  %35 = sbr.rel (!%p33_p10) target bundleno = 21 (0x15), region = 169 }
 0x213   : > { %s2426_s19 = smov %s2421_s15 }
 0x217   :  { %972 = vsyncpa [#allocation3], 1 }
 0x218   :  { %974 = vsyncpa [#allocation3 + $0x1], 1 }
 0x219   :  { %975 = vsyncpa [#allocation6], 1 }
 0x21a   :  { %977 = vsyncpa [#allocation6 + $0x1], 1 }
 0x21b   :  { %978 = vsyncpa [#allocation9], 1 }
 0x21c   :  { %979 = vsyncpa [#allocation12], 1 }
 0x21d   :  { %980 = vsyncpa [#allocation4], 1 }
 0x21e   :  { %982 = vsyncpa [#allocation4 + $0x1], 1 }
 0x21f   :  { %983 = vsyncpa [#allocation15], 1 }
 0x220   :  { %985 = vsyncpa [#allocation15 + $0x1], 1 }

</bundles_post_ra>
